<compile_context>
chip_gen: v7x
topology: tpu7x:2x2x1
jax: 0.10.0
libtpu: 0.0.40
codegen_flags: <defaults>
</compile_context>

<pallas_src>
import functools

import jax
import jax.numpy as jnp
from jax.experimental import pallas as pl
from jax.experimental.pallas import tpu as pltpu


def _round_up(x, m):
    return ((x + m - 1) // m) * m


def _gate_kernel(inp_ref, hid_ref, wi_ref, wh_ref, b_ref, o_ref, *,
                 saturated: bool):
    cd = wi_ref.dtype
    # Two MXU pushes, both accumulating in f32 (activations cast in-kernel).
    pre = jnp.dot(inp_ref[...].astype(cd), wi_ref[...],
                  preferred_element_type=jnp.float32)
    pre = pre + jnp.dot(hid_ref[...].astype(cd), wh_ref[...],
                        preferred_element_type=jnp.float32)
    pre = pre + b_ref[...]  # [1, Hp] broadcast over [Bt, Hp], f32 epilogue
    if saturated:
        # hard gate: (x > 0).float()   (detach is a no-op in the fwd pass)
        o_ref[...] = (pre > 0.0).astype(o_ref.dtype)
    else:
        # soft gate: sigmoid(x)  (exp/recip go to the EUP slot)
        o_ref[...] = jax.nn.sigmoid(pre).astype(o_ref.dtype)


def prepare_gate_params(w_inp, w_hid, b_hid, *, compute_dtype=jnp.float32):
    """One-time parameter prep, hoisted out of the per-timestep call path.

    Args:
      w_inp: [H, I]  (nn.Linear(input_dim, hidden_dim, bias=False).weight)
      w_hid: [H, H]  (nn.Linear(hidden_dim, hidden_dim).weight)
      b_hid: [H]     (nn.Linear(hidden_dim, hidden_dim).bias)
      compute_dtype: dtype for the matmul operands.  bf16 is recommended on
        ALL generations (v5e/v6e/v7x MXUs are bf16-native and it halves the
        weight DMA bytes); accumulation, bias add, and sigmoid stay f32.
        Keep the saturated (hard) gate on f32 operands — the sign compare is
        sensitive to bf16 rounding of near-zero pre-activations.

    Returns:
      w_inp_t: [I, Hp]  transposed, lane-dense-padded input weight
      w_hid_t: [H, Hp]  transposed, lane-dense-padded hidden weight
      b:       [1, Hp]  zero-padded bias, kept in f32
      where Hp = round_up(H, 128).
    """
    H, _ = w_inp.shape
    Hp = max(_round_up(H, 128), 128)
    pad_n = ((0, 0), (0, Hp - H))
    w_inp_t = jnp.pad(w_inp.T, pad_n).astype(compute_dtype)   # [I, Hp]
    w_hid_t = jnp.pad(w_hid.T, pad_n).astype(compute_dtype)   # [H, Hp]
    b = jnp.pad(b_hid, (0, Hp - H)).reshape(1, Hp).astype(jnp.float32)
    return w_inp_t, w_hid_t, b


@functools.partial(
    jax.jit, static_argnames=("hidden_dim", "saturated", "batch_tile"))
def gate_forward(inp, hidden, w_inp_t, w_hid_t, b, *, hidden_dim, saturated,
                 batch_tile=None):
    """Pallas implementation of _Gate.forward with pre-prepared parameters.

    Args:
      inp:     [B, input_dim]  float32 (cast to the weight dtype in-kernel)
      hidden:  [B, hidden_dim] float32
      w_inp_t, w_hid_t, b: outputs of prepare_gate_params (called once).
      hidden_dim: static int, the true (unpadded) hidden size.
      saturated:  static bool.
      batch_tile: static int or None.
        * v7x (2 TensorCores): use batch_tile = B // 2 so each core gets one
          "parallel" grid step (weights stay VMEM-resident via index_map).
        * v5e/v6e (1 TC): leave None — the grid is a serial loop, tiling only
          adds ~0.35 us/step and shrinks the MXU M-fill.
        If batch_tile does not divide B, falls back to the whole-array path.
    Returns:
      [B, hidden_dim] float32 gate values.
    """
    B, I = inp.shape
    H = hidden.shape[1]
    Hp = w_inp_t.shape[1]

    kernel = functools.partial(_gate_kernel, saturated=bool(saturated))
    out_shape = jax.ShapeDtypeStruct((B, Hp), jnp.float32)

    def _nbytes(x):
        return x.size * x.dtype.itemsize

    cost = pl.CostEstimate(
        flops=2 * B * (I + H) * Hp,
        transcendentals=0 if saturated else B * Hp,
        bytes_accessed=int(_nbytes(inp) + _nbytes(hidden) + _nbytes(w_inp_t)
                           + _nbytes(w_hid_t) + _nbytes(b) + B * Hp * 4),
    )

    use_grid = (batch_tile is not None and batch_tile < B
                and B % batch_tile == 0)

    if not use_grid:
        # Whole-array VMEM tiles, no grid machinery (the right choice on
        # single-TC v5e/v6e and for small batches everywhere).
        vmem = pl.BlockSpec(memory_space=pltpu.MemorySpace.VMEM)
        out = pl.pallas_call(
            kernel,
            out_shape=out_shape,
            in_specs=[vmem] * 5,
            out_specs=vmem,
            cost_estimate=cost,
        )(inp, hidden, w_inp_t, w_hid_t, b)
    else:
        # Batch-tiled "parallel" grid (v7x megacore); weights/bias resident.
        out = pl.pallas_call(
            kernel,
            out_shape=out_shape,
            grid=(B // batch_tile,),
            in_specs=[
                pl.BlockSpec((batch_tile, I), lambda i: (i, 0)),
                pl.BlockSpec((batch_tile, H), lambda i: (i, 0)),
                pl.BlockSpec((I, Hp), lambda i: (0, 0)),   # weights resident
                pl.BlockSpec((H, Hp), lambda i: (0, 0)),   # weights resident
                pl.BlockSpec((1, Hp), lambda i: (0, 0)),   # bias resident
            ],
            out_specs=pl.BlockSpec((batch_tile, Hp), lambda i: (i, 0)),
            compiler_params=pltpu.CompilerParams(
                dimension_semantics=("parallel",)),
            cost_estimate=cost,
        )(inp, hidden, w_inp_t, w_hid_t, b)

    return out[:, :hidden_dim] if Hp != hidden_dim else out


def _reference(inp, hidden, w_inp, w_hid, b_hid, saturated):
    pre = inp @ w_inp.T + hidden @ w_hid.T + b_hid
    if saturated:
        return (pre > 0).astype(jnp.float32)
    return jax.nn.sigmoid(pre)


if __name__ == "__main__":
    B, INPUT_DIM, HIDDEN_DIM = 8, 32, 32

    key = jax.random.PRNGKey(0)
    k_inp, k_hid, k_wi, k_wh, k_b = jax.random.split(key, 5)

    inp = jax.random.normal(k_inp, (B, INPUT_DIM), dtype=jnp.float32)
    hidden = jax.random.normal(k_hid, (B, HIDDEN_DIM), dtype=jnp.float32)

    # nn.Linear-layout parameters:
    #   inp: Linear(input_dim, hidden_dim, bias=False) -> W [H, I]
    #   hid: Linear(hidden_dim, hidden_dim)            -> W [H, H], b [H]
    w_inp = 0.1 * jax.random.normal(k_wi, (HIDDEN_DIM, INPUT_DIM), jnp.float32)
    w_hid = 0.1 * jax.random.normal(k_wh, (HIDDEN_DIM, HIDDEN_DIM), jnp.float32)
    b_hid = 0.1 * jax.random.normal(k_b, (HIDDEN_DIM,), jnp.float32)

    # One-time parameter prep (hoisted out of the per-step path).
    wi_f32, wh_f32, b_f32 = prepare_gate_params(w_inp, w_hid, b_hid)

    ok = True

    # f32 path, whole-array (no grid): exact semantics check, hard + soft.
    for saturated in (False, True):
        out = gate_forward(inp, hidden, wi_f32, wh_f32, b_f32,
                           hidden_dim=HIDDEN_DIM, saturated=saturated)
        out = jax.block_until_ready(out)
        ref = _reference(inp, hidden, w_inp, w_hid, b_hid, saturated)
        ok = ok and bool(jnp.allclose(out, ref, atol=1e-5, rtol=1e-5))

    # Larger batch: v7x-style batch_tile = B // 2 (one block per TensorCore).
    B2 = 256
    k_i2, k_h2 = jax.random.split(jax.random.PRNGKey(1), 2)
    inp2 = jax.random.normal(k_i2, (B2, INPUT_DIM), dtype=jnp.float32)
    hid2 = jax.random.normal(k_h2, (B2, HIDDEN_DIM), dtype=jnp.float32)
    for saturated in (False, True):
        out = gate_forward(inp2, hid2, wi_f32, wh_f32, b_f32,
                           hidden_dim=HIDDEN_DIM, saturated=saturated,
                           batch_tile=B2 // 2)
        out = jax.block_until_ready(out)
        ref = _reference(inp2, hid2, w_inp, w_hid, b_hid, saturated)
        ok = ok and bool(jnp.allclose(out, ref, atol=1e-5, rtol=1e-5))

    # Ragged batch_tile falls back to the whole-array path (no assert).
    out = gate_forward(inp, hidden, wi_f32, wh_f32, b_f32,
                       hidden_dim=HIDDEN_DIM, saturated=False, batch_tile=3)
    out = jax.block_until_ready(out)
    ref = _reference(inp, hidden, w_inp, w_hid, b_hid, False)
    ok = ok and bool(jnp.allclose(out, ref, atol=1e-5, rtol=1e-5))

    # bf16-operand path (MXU-native on v5e/v6e/v7x), f32 accumulation; soft
    # gate only (hard gate stays on f32 operands — sign compare is not robust
    # to bf16 rounding of near-zero pre-activations). Looser tolerance.
    wi_bf16, wh_bf16, b_bf16 = prepare_gate_params(
        w_inp, w_hid, b_hid, compute_dtype=jnp.bfloat16)
    out = gate_forward(inp, hidden, wi_bf16, wh_bf16, b_bf16,
                       hidden_dim=HIDDEN_DIM, saturated=False)
    out = jax.block_until_ready(out)
    ref = _reference(inp, hidden, w_inp, w_hid, b_hid, False)
    ok = ok and bool(jnp.allclose(out, ref, atol=3e-2, rtol=3e-2))

    print("KERNEL_OK" if ok else "KERNEL_MISMATCH")
</pallas_src>

<mosaic_0001>
module attributes {stable_mosaic.version = 11 : i64} {
  func.func @_gate_kernel(%arg0: memref<8x32xf32, #tpu.memory_space<vmem>>, %arg1: memref<8x32xf32, #tpu.memory_space<vmem>>, %arg2: memref<32x128xf32, #tpu.memory_space<vmem>>, %arg3: memref<32x128xf32, #tpu.memory_space<vmem>>, %arg4: memref<1x128xf32, #tpu.memory_space<vmem>>, %arg5: memref<8x128xf32, #tpu.memory_space<vmem>>) attributes {dimension_semantics = [], scalar_prefetch = 0 : i64, scratch_operands = 0 : i64, tpu.core_type = #tpu.core_type<tc>} {
    %c0 = arith.constant 0 : index
    %c0_0 = arith.constant 0 : index
    %0 = vector.load %arg0[%c0, %c0_0] : memref<8x32xf32, #tpu.memory_space<vmem>>, vector<8x32xf32>
    %c0_1 = arith.constant 0 : index
    %c0_2 = arith.constant 0 : index
    %1 = vector.load %arg2[%c0_1, %c0_2] : memref<32x128xf32, #tpu.memory_space<vmem>>, vector<32x128xf32>
    %cst = arith.constant dense<0.000000e+00> : vector<8x128xf32>
    %2 = tpu.matmul %0, %1, %cst {dimension_numbers = #tpu.dot_dimension_numbers<[1], [0], [0], [1], [0, 0, 1, 1], [], []>} : vector<8x32xf32>, vector<32x128xf32>, vector<8x128xf32> -> vector<8x128xf32>
    %c0_3 = arith.constant 0 : index
    %c0_4 = arith.constant 0 : index
    %3 = vector.load %arg1[%c0_3, %c0_4] : memref<8x32xf32, #tpu.memory_space<vmem>>, vector<8x32xf32>
    %c0_5 = arith.constant 0 : index
    %c0_6 = arith.constant 0 : index
    %4 = vector.load %arg3[%c0_5, %c0_6] : memref<32x128xf32, #tpu.memory_space<vmem>>, vector<32x128xf32>
    %cst_7 = arith.constant dense<0.000000e+00> : vector<8x128xf32>
    %5 = tpu.matmul %3, %4, %cst_7 {dimension_numbers = #tpu.dot_dimension_numbers<[1], [0], [0], [1], [0, 0, 1, 1], [], []>} : vector<8x32xf32>, vector<32x128xf32>, vector<8x128xf32> -> vector<8x128xf32>
    %6 = arith.addf %2, %5 : vector<8x128xf32>
    %c0_8 = arith.constant 0 : index
    %c0_9 = arith.constant 0 : index
    %7 = vector.load %arg4[%c0_8, %c0_9] : memref<1x128xf32, #tpu.memory_space<vmem>>, vector<1x128xf32>
    %8 = vector.broadcast %7 : vector<1x128xf32> to vector<8x128xf32>
    %9 = arith.addf %6, %8 : vector<8x128xf32>
    %10 = arith.negf %9 : vector<8x128xf32>
    %11 = math.exp %10 : vector<8x128xf32>
    %cst_10 = arith.constant 1.000000e+00 : f32
    %12 = vector.broadcast %cst_10 : f32 to vector<8x128xf32>
    %13 = arith.addf %12, %11 : vector<8x128xf32>
    %14 = arith.divf %12, %13 : vector<8x128xf32>
    %c0_11 = arith.constant 0 : index
    %c0_12 = arith.constant 0 : index
    %15 = vector.load %arg5[%c0_11, %c0_12] : memref<8x128xf32, #tpu.memory_space<vmem>>, vector<8x128xf32>
    tpu.vector_store %arg5[%c0_11, %c0_12], %14 {strides = array<i32>} : memref<8x128xf32, #tpu.memory_space<vmem>>, vector<8x128xf32>,
    return
  }
}

</mosaic_0001>

<bundles_post_ra>
// kernel: gate_forward.1
= control target key start
LH: loop header
LB: loop body
LE: loop exit
PB: predicated region body
PF: predicated region fallthrough
CT: control target
= control target key end

     0   :  { %10 = vsyncpa [#allocation3], 0  ;;  %s544_s0 = inlined_call_operand.hbm [shape: f32[8,32], index: 0, kind: input, shape index: {}]   ;;  %s545_s1 = inlined_call_operand.hbm [shape: f32[8,32], index: 1, kind: input, shape index: {}]   ;;  %s546_s2 = inlined_call_operand.hbm [shape: f32[32,128], index: 2, kind: input, shape index: {}]   ;;  %s547_s3 = inlined_call_operand.hbm [shape: f32[32,128], index: 3, kind: input, shape index: {}]   ;;  %s548_s4 = inlined_call_operand.vmem [shape: f32[1,128], index: 4, kind: input, shape index: {}]   ;;  %s549_s5 = inlined_call_operand.hbm [shape: f32[8,128], index: 5, kind: output, shape index: {}]  }
   0x1   :  { %11 = vsyncpa [#allocation6], 0 }
   0x2   :  { %12 = vsyncpa [#allocation9], 0 }
   0x3   :  { %13 = vsyncpa [#allocation4], 0  ;;  %s441_s18 = smov [#allocation5]   ;;  %s442_s20 = smov [#allocation2]  }
   0x4   :  { %s30_s19 = sshll.u32 %s441_s18, 4  ;;  %s20_s21 = sshll.u32 %s442_s20, 4  ;;  %s31_s19 = int_to_ptr.vmem [resolvable:$true] %s30_s19  ;;  %s21_s21 = int_to_ptr.vmem [resolvable:$true] %s20_s21 }
   0x5   :  { %s323_s24 = scalar_lea.hbm %s545_s1, 128 }
   0x6   :  { %p324_p0 = scmp.ne.s32.totalorder %s545_s1, %s323_s24  ;;  %p327_p1 = scmp.lt.u32.totalorder %s323_s24, %s545_s1 }
   0x8   :  { %p329_p2 = pnand %p327_p1, %p324_p0 }
   0xa   :  { %332 = shalt.err (!%p329_p2)
}
   0xb   :  { %s333_s29 = scalar_lea.vmem %s31_s19, 128  ;;  %p338_p4 = scmp.lt.s32.totalorder %s31_s19, %s31_s19 }
   0xc   :  { %p334_p3 = scmp.ne.s32.totalorder %s31_s19, %s333_s29  ;;  %p339_p5 = scmp.lt.s32.totalorder %s333_s29, %s333_s29 }
   0xe   :  { %p340_p6 = por %p339_p5, %p338_p4 }
  0x10   :  { %p341_p7 = pnand %p340_p6, %p334_p3 }
  0x12   :  { %344 = shalt.err (!%p341_p7)
}
  0x13   :  { %33 = dma.hbm_to_vmem [thread:$0]  %s545_s1, 128, %s31_s19, [#allocation6]  }
  0x14   :  { %s345_s9 = scalar_lea.hbm %s544_s0, 128 }
  0x15   :  { %p346_p8 = scmp.ne.s32.totalorder %s544_s0, %s345_s9  ;;  %p349_p9 = scmp.lt.u32.totalorder %s345_s9, %s544_s0 }
  0x17   :  { %p351_p10 = pnand %p349_p9, %p346_p8 }
  0x19   :  { %354 = shalt.err (!%p351_p10)
}
  0x1a   :  { %s355_s14 = scalar_lea.vmem %s21_s21, 128  ;;  %p360_p12 = scmp.lt.s32.totalorder %s21_s21, %s21_s21 }
  0x1b   :  { %p356_p11 = scmp.ne.s32.totalorder %s21_s21, %s355_s14  ;;  %p361_p13 = scmp.lt.s32.totalorder %s355_s14, %s355_s14 }
  0x1d   :  { %p362_p0 = por %p361_p13, %p360_p12 }
  0x1f   :  { %p363_p1 = pnand %p362_p0, %p356_p11 }
  0x21   :  { %366 = shalt.err (!%p363_p1)
}
  0x22   :  { %23 = dma.hbm_to_vmem [thread:$0]  %s544_s0, 128, %s21_s21, [#allocation3]  }
  0x23   :  { %s443_s16 = smov [#allocation7]   ;;  %s367_s20 = scalar_lea.hbm %s546_s2, 512 }
  0x24   :  { %s39_s17 = sshll.u32 %s443_s16, 4  ;;  %p368_p2 = scmp.ne.s32.totalorder %s546_s2, %s367_s20  ;;  %s40_s17 = int_to_ptr.vmem [resolvable:$true] %s39_s17 }
  0x25   :  { %p371_p3 = scmp.lt.u32.totalorder %s367_s20, %s546_s2 }
  0x27   :  { %p373_p4 = pnand %p371_p3, %p368_p2 }
  0x29   :  { %376 = shalt.err (!%p373_p4)
}
  0x2a   :  { %s377_s26 = scalar_lea.vmem %s40_s17, 512  ;;  %p382_p6 = scmp.lt.s32.totalorder %s40_s17, %s40_s17 }
  0x2b   :  { %p378_p5 = scmp.ne.s32.totalorder %s40_s17, %s377_s26  ;;  %p383_p7 = scmp.lt.s32.totalorder %s377_s26, %s377_s26 }
  0x2d   :  { %p384_p8 = por %p383_p7, %p382_p6 }
  0x2f   :  { %p385_p9 = pnand %p384_p8, %p378_p5 }
  0x31   :  { %388 = shalt.err (!%p385_p9)
}
  0x32   :  { %s444_s0 = smov 128   ;;  %s445_s21 = smov 8  }
  0x33   :  { %45 = dma.hbm_to_vmem [thread:$0]  %s546_s2, 512, %s40_s17, [#allocation6], %s444_s0, %s444_s0, %s445_s21  }
  0x34   :  { %s446_s29 = smov [#allocation8]   ;;  %s389_s8 = scalar_lea.hbm %s547_s3, 512 }
  0x35   :  { %s51_s30 = sshll.u32 %s446_s29, 4  ;;  %p390_p10 = scmp.ne.s32.totalorder %s547_s3, %s389_s8  ;;  %s52_s30 = int_to_ptr.vmem [resolvable:$true] %s51_s30 }
  0x36   :  { %p393_p11 = scmp.lt.u32.totalorder %s389_s8, %s547_s3 }
  0x38   :  { %p395_p12 = pnand %p393_p11, %p390_p10 }
  0x3a   :  { %398 = shalt.err (!%p395_p12)
}
  0x3b   :  { %s399_s13 = scalar_lea.vmem %s52_s30, 512  ;;  %p404_p0 = scmp.lt.s32.totalorder %s52_s30, %s52_s30 }
  0x3c   :  { %p400_p13 = scmp.ne.s32.totalorder %s52_s30, %s399_s13  ;;  %p405_p1 = scmp.lt.s32.totalorder %s399_s13, %s399_s13 }
  0x3e   :  { %p406_p2 = por %p405_p1, %p404_p0 }
  0x40   :  { %p407_p3 = pnand %p406_p2, %p400_p13 }
  0x42   :  { %410 = shalt.err (!%p407_p3)
}
  0x43   :  { %57 = dma.hbm_to_vmem [thread:$0]  %s547_s3, 512, %s52_s30, [#allocation9], %s444_s0, %s444_s0, %s445_s21  }
  0x44   :  { %433 = dma.done.wait [#allocation3], 128  }
  0x45   :  { %434 = vsyncadd [#allocation3], 4294967168 }
  0x46   :  { %435 = dma.done.wait [#allocation6], 640  }
  0x47   :  { %436 = vsyncadd [#allocation6], 4294966656 }
  0x48   :  { %437 = dma.done.wait [#allocation9], 512  }
  0x49   :  { %438 = vsyncadd [#allocation9], 4294966784  ;;  %v447_v0 = vmov 0.0|0.0   ;;  %vm448_vm0 = vmmov 0   ;;  %v449_v1 = vmov 0.0   ;;  %v78_v2 = vld [vmem:[#allocation8] sm:$0xff] }
  0x4a   :  { %297 = vmatprep.subr.bf16.mxu0 %v447_v0  ;;  %303 = vmatprep.subr.bf16.mxu1 %v447_v0  ;;  %v79_v3 = vld [vmem:[#allocation8 + $0x8] sm:$0xff]  ;;  %v73_v4 = vld [vmem:[#allocation7] sm:$0xff]  ;;  %v80_v7 = vld [vmem:[#allocation8 + $0x10] sm:$0xff]  ;;  %vm82_vm1 = vcmask 261120   ;;  %s450_s15 = smov [#allocation10]  }
  0x4b   :  { %283 = vmatprep.mubr.msk.f32.mxu0 %vm448_vm0, %v449_v1  ;;  %294 = vmatprep.mubr.msk.f32.mxu1 %vm448_vm0, %v449_v1  ;;  %v298_v5 = vpack.c.bf16 %v79_v3, %v78_v2  ;;  %v74_v6 = vld [vmem:[#allocation7 + $0x8] sm:$0xff]  ;;  %v81_v8 = vld [vmem:[#allocation8 + $0x18] sm:$0xff]  ;;  %v75_v10 = vld [vmem:[#allocation7 + $0x10] sm:$0xff]  ;;  %s250_s16 = sshll.u32 %s450_s15, 4  ;;  %s251_s16 = int_to_ptr.vmem [resolvable:$true] %s250_s16 }
  0x4c   :  { %v304_v9 = vpack.c.bf16 %v74_v6, %v73_v4  ;;  %v76_v11 = vld [vmem:[#allocation7 + $0x18] sm:$0xff]  ;;  %v301_v12 = vpack.c.bf16 %v81_v8, %v80_v7  ;;  %v72_v15 = vld [vmem:[#allocation2] sm:$0xff]  ;;  %s411_s17 = scalar_lea.vmem %s251_s16, 128  ;;  %p416_p5 = scmp.lt.s32.totalorder %s251_s16, %s251_s16 }
  0x4d   :  { %299 = vmatpush3.bf16.msra.mxu0 %v298_v5  ;;  %v307_v13 = vpack.c.bf16 %v76_v11, %v75_v10  ;;  %v77_v14 = vld [vmem:[#allocation5] sm:$0xff]  ;;  %v263_v18 = vld [vmem:[%s548_s4] ss:$0 sm:$0xff]  ;;  %p412_p4 = scmp.ne.s32.totalorder %s251_s16, %s411_s17  ;;  %p417_p6 = scmp.lt.s32.totalorder %s411_s17, %s411_s17 }
  0x4e   :  { %305 = vmatpush3.bf16.msra.mxu1 %v304_v9  ;;  %300 = vmatprep.subr.bf16.mxu0 %v447_v0 }
  0x4f   :  { %306 = vmatprep.subr.bf16.mxu1 %v447_v0  ;;  %p418_p7 = por %p417_p6, %p416_p5 }
  0x51   :  { %302 = vmatpush3.bf16.msra.mxu0 %v301_v12  ;;  %p419_p8 = pnand %p418_p7, %p412_p4 }
  0x52   :  { %308 = vmatpush3.bf16.msra.mxu1 %v307_v13 }
  0x54   :  { %284 = vmatmul.mubr.msk.f32.vlgmr.msra.gmra.mrb[0].mxu0 %vm82_vm1, %v77_v14 }
  0x55   :  { %295 = vmatmul.mubr.msk.f32.vlgmr.msra.gmra.mrb[0].mxu1 %vm82_vm1, %v72_v15 }
 0x127   :  { %v152_v16 = vpop.f32.mrb[0].mxu0 }
 0x128   :  { %v225_v17 = vpop.f32.mrb[0].mxu1  ;;  %v285_v19 = vpop.f32.mrb[1].mxu0 }
 0x129   :  { %v226_v20 = vadd.f32 %v225_v17, %v152_v16  ;;  %v296_v21 = vpop.f32.mrb[1].mxu1 }
 0x12b   :  { %v236_v22 = vadd.f32 %v263_v18, %v226_v20 }
 0x12d   :  { %v264_v23 = vmul.f32 -1.442695, %v236_v22 }
 0x12f   :  { %319 = vpow2.f32 %v264_v23 }
 0x139   :  { %v320_v24 = vpop.eup %319 }
 0x13a   :  { %v240_v25 = vadd.f32 1.0, %v320_v24 }
 0x13c   :  { %321 = vrcp.f32 %v240_v25 }
 0x146   :  { %v322_v26 = vpop.eup %321 }
 0x147   :  { %243 = vst [vmem:[#allocation10] sm:$0xff] %v322_v26 }
 0x148   :  { %422 = shalt.err (!%p419_p8)
}
 0x149   :  { %s423_s19 = scalar_lea.hbm %s549_s5, 128 }
 0x14a   :  { %p424_p9 = scmp.ne.s32.totalorder %s549_s5, %s423_s19  ;;  %p427_p10 = scmp.lt.u32.totalorder %s423_s19, %s549_s5 }
 0x14c   :  { %p429_p11 = pnand %p427_p10, %p424_p9 }
 0x14e   :  { %432 = shalt.err (!%p429_p11)
}
 0x14f   :  { %253 = dma.vmem_to_hbm [thread:$0]  %s251_s16, 128, %s549_s5, [#allocation4]  }
 0x150   :  { %439 = dma.done.wait [#allocation4], 128  }
 0x151   :  { %440 = vsyncadd [#allocation4], 4294967168 }
 0x152   :  { %257 = vsyncpa [#allocation3], 1 }
 0x153   :  { %258 = vsyncpa [#allocation6], 1 }
 0x154   :  { %259 = vsyncpa [#allocation9], 1 }
 0x155   :  { %260 = vsyncpa [#allocation4], 1 }

</bundles_post_ra>
